<compile_context>
chip_gen: v5e
topology: v5e:2x2
jax: 0.10.0
libtpu: 0.0.40
codegen_flags: <defaults>
</compile_context>

<pallas_src>
import math
import functools

import jax
import jax.numpy as jnp
from jax import lax
from jax.experimental import pallas as pl
from jax.experimental.pallas import tpu as pltpu


# ----------------------------------------------------------------------------
# Buffer construction — mirrors the PyTorch register_buffer exactly.
# ----------------------------------------------------------------------------
def make_sinusoidal_pe(max_len: int, d_model: int, dtype=jnp.float32) -> jnp.ndarray:
    assert d_model % 2 == 0, "d_model must be even (same latent constraint as the PyTorch module)"
    position = jnp.arange(0, max_len, dtype=jnp.float32)[:, None]              # [L, 1]
    div_term = jnp.exp(
        jnp.arange(0, d_model, 2, dtype=jnp.float32) * (-(math.log(10000.0) / d_model))
    )                                                                           # [D/2]
    pe = jnp.zeros((max_len, d_model), dtype=jnp.float32)
    pe = pe.at[:, 0::2].set(jnp.sin(position * div_term))
    pe = pe.at[:, 1::2].set(jnp.cos(position * div_term))
    return pe[None, :, :].astype(dtype)                                         # [1, L, D]


# ----------------------------------------------------------------------------
# Stateless per-element PRNG: lowbias32-style avalanche mix (uint32 -> uint32).
# ----------------------------------------------------------------------------
def _mix_u32(x):
    x = x ^ (x >> 16)
    x = x * jnp.uint32(0x7FEB352D)
    x = x ^ (x >> 15)
    x = x * jnp.uint32(0x846CA68B)
    x = x ^ (x >> 16)
    return x


# ----------------------------------------------------------------------------
# Kernel: y = x + pe  (+ inverted dropout).
# ----------------------------------------------------------------------------
def _pe_dropout_kernel(seed_ref, x_ref, pe_ref, o_ref, *, p: float, seq_stride: int):
    # x_ref / o_ref blocks: (bb, ts, D); pe_ref block: (1, ts, D) -> broadcasts over batch.
    y = x_ref[...] + pe_ref[...]                      # add in x.dtype (bf16-native on v6e/v7x)

    if p > 0.0:
        bb, ts, d = x_ref.shape
        b0 = pl.program_id(1) * bb
        s0 = pl.program_id(0) * ts
        bi = lax.broadcasted_iota(jnp.int32, (bb, ts, d), 0) + b0
        si = lax.broadcasted_iota(jnp.int32, (bb, ts, d), 1) + s0
        di = lax.broadcasted_iota(jnp.int32, (bb, ts, d), 2)
        # Global element counter (wraps only for >2^32 elements — statistically harmless),
        # salted with the seed via a golden-ratio odd multiplier.  Stateless per element,
        # so the grid stays fully "parallel" (megacore-shardable).
        salt = seed_ref[0] * jnp.int32(-1640531535)   # 0x9E3779B1 as wrapped int32
        flat = ((bi * seq_stride + si) * d + di) ^ salt
        bits = _mix_u32(flat.astype(jnp.uint32))
        threshold = jnp.uint32(min(int(p * 4294967296.0), 4294967295))
        keep = bits >= threshold                      # P(keep) = 1 - p (bias < 2^-32)
        # f32 dropout math: exact 1/(1-p) scale, 32-bit mask matches 32-bit data.
        y32 = y.astype(jnp.float32) * jnp.float32(1.0 / (1.0 - p))
        y = jnp.where(keep, y32, jnp.zeros_like(y32))

    o_ref[...] = y.astype(o_ref.dtype)


# ----------------------------------------------------------------------------
# Tile sizing: generation-aware byte target, no artificial row cap.
# ----------------------------------------------------------------------------
def _vmem_target_and_limit():
    try:
        cap = pltpu.get_tpu_info().vmem_capacity_bytes
    except Exception:
        cap = None
    if cap is not None and cap >= 100 * 1024 * 1024:     # v5e / v6e: 128 MiB physical VMEM
        return 6 * 1024 * 1024, 96 * 1024 * 1024
    # v7x (64 MiB physical VMEM) or unknown backend: conservative. ~6 blocks live = 24 MiB.
    return 4 * 1024 * 1024, 48 * 1024 * 1024


def _choose_tiles(B: int, S: int, D: int, itemsize: int, target_bytes: int):
    """Returns (bb, ts): batch rows and sequence rows per block."""
    row_bytes = max(1, D * itemsize)
    rows = max(8, (target_bytes // row_bytes) // 8 * 8)   # sublane multiple, no row cap
    if rows < S:
        return 1, rows                                    # tile the sequence
    # Whole sequence fits: fold batch rows into the block to amortise per-step overhead.
    bb = max(1, min(B, target_bytes // max(1, S * row_bytes)))
    return bb, S                                          # full-extent ts always legal


# ----------------------------------------------------------------------------
# Wrapper.
# ----------------------------------------------------------------------------
def absolute_positional_encoding(
    x: jnp.ndarray,
    pe_full: jnp.ndarray,
    *,
    dropout_p: float = 0.0,
    seed: int = 0,
) -> jnp.ndarray:
    """x: [B, S, D]; pe_full: [1, max_len, D] buffer (ideally already stored in x.dtype)."""
    B, S, D = x.shape
    assert pe_full.ndim == 3 and pe_full.shape[0] == 1 and pe_full.shape[2] == D
    assert S <= pe_full.shape[1], "sequence length exceeds max_len of the PE buffer"
    assert 0.0 <= dropout_p < 1.0
    if pe_full.dtype != x.dtype:                          # ideally done once at buffer creation
        pe_full = pe_full.astype(x.dtype)

    orig_D = D
    if D % 128 != 0:
        # Lane-dense output: pad d_model so stores are unmasked vst (no-op when 128-aligned).
        Dp = ((D + 127) // 128) * 128
        x = jnp.pad(x, ((0, 0), (0, 0), (0, Dp - D)))
        pe_full = jnp.pad(pe_full, ((0, 0), (0, 0), (0, Dp - D)))
        D = Dp

    target_bytes, vmem_limit = _vmem_target_and_limit()
    bb, ts = _choose_tiles(B, S, D, x.dtype.itemsize, target_bytes)
    n_seq = pl.cdiv(S, ts)
    n_bat = pl.cdiv(B, bb)
    seed_arr = jnp.asarray([seed], dtype=jnp.int32)

    kernel = functools.partial(
        _pe_dropout_kernel, p=float(dropout_p), seq_stride=int(n_seq * ts)
    )

    grid_spec = pltpu.PrefetchScalarGridSpec(
        num_scalar_prefetch=1,
        grid=(n_seq, n_bat),                              # seq OUTER, batch INNER
        in_specs=[
            pl.BlockSpec((bb, ts, D), lambda s, b, seed: (b, s, 0)),   # x
            pl.BlockSpec((1, ts, D), lambda s, b, seed: (0, s, 0)),    # pe: batch-invariant
        ],
        out_specs=pl.BlockSpec((bb, ts, D), lambda s, b, seed: (b, s, 0)),
    )

    out = pl.pallas_call(
        kernel,
        out_shape=jax.ShapeDtypeStruct((B, S, D), x.dtype),
        grid_spec=grid_spec,
        compiler_params=pltpu.CompilerParams(
            dimension_semantics=("parallel", "parallel"),
            vmem_limit_bytes=vmem_limit,
        ),
    )(seed_arr, x, pe_full)

    if orig_D != D:
        out = out[..., :orig_D]
    return out


# ----------------------------------------------------------------------------
# Demo / self-check
# ----------------------------------------------------------------------------
if __name__ == "__main__":
    B, S, D = 2, 16, 128
    MAX_LEN = 64

    key = jax.random.PRNGKey(0)
    x = jax.random.normal(key, (B, S, D), dtype=jnp.float32)
    pe_full = make_sinusoidal_pe(MAX_LEN, D, dtype=x.dtype)

    ref = x + pe_full[:, :S, :]

    # Eval-mode (p = 0): exact match with x + pe.
    out = absolute_positional_encoding(x, pe_full, dropout_p=0.0, seed=0)
    out = jax.block_until_ready(out)
    assert out.shape == x.shape and out.dtype == x.dtype
    assert jnp.allclose(out, ref, atol=1e-6, rtol=1e-6), "mismatch vs reference (p=0)"

    # Train-mode (p = 0.5): every element must be 0 or ref / (1 - p); drop rate sane.
    p = 0.5
    out_d = absolute_positional_encoding(x, pe_full, dropout_p=p, seed=123)
    out_d = jax.block_until_ready(out_d)
    scaled = ref / (1.0 - p)
    is_zero = jnp.abs(out_d) < 1e-6
    is_scaled = jnp.abs(out_d - scaled) < 1e-4
    assert bool(jnp.all(is_zero | is_scaled)), "dropout output not in {0, scaled} set"
    drop_frac = float(jnp.mean(is_zero.astype(jnp.float32)))
    assert 0.2 < drop_frac < 0.8, f"dropout fraction {drop_frac} implausible for p={p}"

    print("KERNEL_OK")
</pallas_src>

<mosaic_0001>
module attributes {stable_mosaic.version = 11 : i64} {
  func.func @_pe_dropout_kernel(%arg0: i32, %arg1: i32, %arg2: memref<1xi32, #tpu.memory_space<smem>>, %arg3: memref<2x16x128xf32, #tpu.memory_space<vmem>>, %arg4: memref<1x16x128xf32, #tpu.memory_space<vmem>>, %arg5: memref<2x16x128xf32, #tpu.memory_space<vmem>>) attributes {dimension_semantics = [#tpu.dimension_semantics<parallel>, #tpu.dimension_semantics<parallel>], iteration_bounds = array<i64: 1, 1>, scalar_prefetch = 1 : i64, scratch_operands = 0 : i64, tpu.core_type = #tpu.core_type<tc>, window_params = [{transform_indices = @transform_0, window_bounds = array<i64: 2, 16, 128>}, {transform_indices = @transform_1, window_bounds = array<i64: 1, 16, 128>}, {transform_indices = @transform_2, window_bounds = array<i64: 2, 16, 128>}]} {
    %c0 = arith.constant 0 : index
    %c0_0 = arith.constant 0 : index
    %c0_1 = arith.constant 0 : index
    %0 = vector.load %arg3[%c0, %c0_0, %c0_1] : memref<2x16x128xf32, #tpu.memory_space<vmem>>, vector<2x16x128xf32>
    %c0_2 = arith.constant 0 : index
    %c0_3 = arith.constant 0 : index
    %c0_4 = arith.constant 0 : index
    %1 = vector.load %arg4[%c0_2, %c0_3, %c0_4] : memref<1x16x128xf32, #tpu.memory_space<vmem>>, vector<1x16x128xf32>
    %2 = vector.broadcast %1 : vector<1x16x128xf32> to vector<2x16x128xf32>
    %3 = arith.addf %0, %2 : vector<2x16x128xf32>
    %c0_5 = arith.constant 0 : index
    %c0_6 = arith.constant 0 : index
    %c0_7 = arith.constant 0 : index
    %4 = vector.load %arg5[%c0_5, %c0_6, %c0_7] : memref<2x16x128xf32, #tpu.memory_space<vmem>>, vector<2x16x128xf32>
    tpu.vector_store %arg5[%c0_5, %c0_6, %c0_7], %3 {strides = array<i32>} : memref<2x16x128xf32, #tpu.memory_space<vmem>>, vector<2x16x128xf32>,
    return
  }
  func.func @transform_0(%arg0: i32, %arg1: i32, %arg2: memref<1xi32, #tpu.memory_space<smem>>) -> (i32, i32, i32) {
    %c0_i32 = arith.constant 0 : i32
    %c0_i32_0 = arith.constant 0 : i32
    return %arg1, %arg0, %c0_i32 : i32, i32, i32
  }
  func.func @transform_1(%arg0: i32, %arg1: i32, %arg2: memref<1xi32, #tpu.memory_space<smem>>) -> (i32, i32, i32) {
    %c0_i32 = arith.constant 0 : i32
    %c0_i32_0 = arith.constant 0 : i32
    %c0_i32_1 = arith.constant 0 : i32
    return %c0_i32, %arg0, %c0_i32_0 : i32, i32, i32
  }
  func.func @transform_2(%arg0: i32, %arg1: i32, %arg2: memref<1xi32, #tpu.memory_space<smem>>) -> (i32, i32, i32) {
    %c0_i32 = arith.constant 0 : i32
    %c0_i32_0 = arith.constant 0 : i32
    return %arg1, %arg0, %c0_i32 : i32, i32, i32
  }
}

</mosaic_0001>

<bundles_post_ra>
// kernel: tpu_custom_call.1
= control target key start
LH: loop header
LB: loop body
LE: loop exit
PB: predicated region body
PF: predicated region fallthrough
CT: control target
= control target key end

     0   :  { %9 = vsyncpa [#allocation5], 0  ;;  %s206_s0 = inlined_call_operand.<no memory space> [shape: s32[1], index: 0, kind: input, shape index: {}]   ;;  %s207_s1 = inlined_call_operand.hbm [shape: f32[2,16,128], index: 1, kind: input, shape index: {}]   ;;  %s208_s2 = inlined_call_operand.hbm [shape: f32[1,64,128], index: 2, kind: input, shape index: {}]   ;;  %s209_s3 = inlined_call_operand.hbm [shape: f32[2,16,128], index: 3, kind: output, shape index: {}]  }
   0x1   :  { %10 = vsyncpa [#allocation8], 0 }
   0x2   :  { %11 = vsyncpa [#allocation6], 0  ;;  %s16_s14 = sshll.u32 %s207_s1, 4  ;;  %s163_s15 = smov [#allocation4]   ;;  %s17_s14 = int_to_ptr.hbm [resolvable:$true] %s16_s14 }
   0x3   :  { %s18_s16 = sshll.u32 %s163_s15, 4  ;;  %s29_s18 = sshll.u32 %s208_s2, 4  ;;  %s19_s16 = int_to_ptr.vmem [resolvable:$true] %s18_s16  ;;  %s30_s18 = int_to_ptr.hbm [resolvable:$true] %s29_s18 }
   0x4   :  { %s164_s19 = smov 128   ;;  %s165_s20 = smov 8  }
   0x5   :  { %24 = dma.hbm_to_vmem [thread:$0]  %s17_s14, 512, %s19_s16, [#allocation5], %s164_s19, %s164_s19, %s165_s20  }
   0x6   :  { %s166_s21 = smov [#allocation7]  }
   0x7   :  { %s31_s22 = sshll.u32 %s166_s21, 4  ;;  %s32_s22 = int_to_ptr.vmem [resolvable:$true] %s31_s22 }
   0x8   :  { %37 = dma.hbm_to_vmem [thread:$0]  %s30_s18, 256, %s32_s22, [#allocation8], %s164_s19, %s164_s19, %s165_s20  }
   0x9   :  { %157 = dma.done.wait [#allocation5], 512  }
   0xa   :  { %158 = vsyncadd [#allocation5], 4294966784 }
   0xb   :  { %159 = dma.done.wait [#allocation8], 256  }
   0xc   :  { %160 = vsyncadd [#allocation8], 4294967040  ;;  %v46_v0 = vld [vmem:[#allocation4] sm:$0xff]  ;;  %v47_v2 = vld [vmem:[#allocation4 + $0x8] sm:$0xff]  ;;  %s167_s1 = smov [#allocation9]   ;;  %s66_s25 = sshll.u32 %s209_s3, 4  ;;  %s67_s25 = int_to_ptr.hbm [resolvable:$true] %s66_s25 }
   0xd   :  { %v50_v1 = vld [vmem:[#allocation7] sm:$0xff]  ;;  %v51_v4 = vld [vmem:[#allocation7 + $0x8] sm:$0xff]  ;;  %v48_v5 = vld [vmem:[#allocation4 + $0x10] sm:$0xff]  ;;  %s64_s2 = sshll.u32 %s167_s1, 4  ;;  %s65_s2 = int_to_ptr.vmem [resolvable:$true] %s64_s2 }
   0xe   :  { %v52_v3 = vadd.f32 %v50_v1, %v46_v0  ;;  %v49_v6 = vld [vmem:[#allocation4 + $0x18] sm:$0xff]  ;;  %v53_v7 = vadd.f32 %v51_v4, %v47_v2  ;;  %v54_v8 = vadd.f32 %v50_v1, %v48_v5 }
   0xf   :  { %v55_v9 = vadd.f32 %v51_v4, %v49_v6 }
  0x10   :  { %56 = vst [vmem:[#allocation9] sm:$0xff] %v52_v3 }
  0x11   :  { %57 = vst [vmem:[#allocation9 + $0x8] sm:$0xff] %v53_v7 }
  0x12   :  { %58 = vst [vmem:[#allocation9 + $0x10] sm:$0xff] %v54_v8 }
  0x13   :  { %59 = vst [vmem:[#allocation9 + $0x18] sm:$0xff] %v55_v9 }
  0x14   :  { %72 = dma.vmem_to_hbm [thread:$0]  %s65_s2, 512, %s67_s25, [#allocation6], %s164_s19, %s164_s19, %s165_s20  }
  0x15   :  { %161 = dma.done.wait [#allocation6], 512  }
  0x16   :  { %162 = vsyncadd [#allocation6], 4294966784 }
  0x17   :  { %77 = vsyncpa [#allocation5], 1 }
  0x18   :  { %78 = vsyncpa [#allocation8], 1 }
  0x19   :  { %79 = vsyncpa [#allocation6], 1 }

</bundles_post_ra>
